<compile_context>
chip_gen: v5e
topology: v5e:2x2
jax: 0.10.0
libtpu: 0.0.40
codegen_flags: <defaults>
</compile_context>

<pallas_src>
import functools

import numpy as np

import jax
import jax.numpy as jnp
from jax import lax
from jax.experimental import pallas as pl
from jax.experimental.pallas import tpu as pltpu

EPS = 1e-5


def _residual_body(x_ref, w1_ref, b1_ref, w2_ref, b2_ref, out_ref, get_mask,
                   *, width):
    """ReLU -> 3x3 conv (single im2col matmul) + BN1 + ReLU -> 1x1 conv + BN2 -> +x.

    x_ref  : (1, C, L) f32   channels on sublanes, flattened pixels on lanes
    w1_ref : (C, 9C)   bf16  3x3 conv weight, im2col layout, BN1 scale folded
    b1_ref : (C, 1)    f32   folded BN1 shift
    w2_ref : (C, C)    bf16  1x1 conv weight, BN2 scale folded
    b2_ref : (C, 1)    f32   folded BN2 shift
    out_ref: (1, C, L) f32
    get_mask(t, dy, dx) -> (1, L) bool mask or None (tap always valid).
    """
    L = x_ref.shape[-1]

    x = x_ref[0]                              # (C, L) f32, stays resident
    h = jnp.maximum(x, 0.0)                   # first ReLU

    # im2col: 9 lane-rotated copies of h stacked along sublanes -> (9C, L).
    # Rolls stay f32 (XLU slot, known-good lowering); masking is done in f32
    # (v5e-safe) and each tap is cast to bf16 *before* the big concat so the
    # live im2col tensor and the MXU operand are half-width.
    offsets = [(dy, dx) for dy in (-1, 0, 1) for dx in (-1, 0, 1)]
    taps = []
    for t, (dy, dx) in enumerate(offsets):
        shift = (-(dy * width + dx)) % L
        v = h if shift == 0 else pltpu.roll(h, shift=shift, axis=1)
        m = get_mask(t, dy, dx)
        if m is not None:
            v = jnp.where(m, v, 0.0)          # == Conv2d zero padding (ReLU(0)==0)
        taps.append(v.astype(jnp.bfloat16))
    patches = jnp.concatenate(taps, axis=0)   # (9C, L) bf16

    # 3x3 conv + folded BN1 + ReLU: one MXU pass with K = 9C.
    y = jnp.dot(w1_ref[...], patches, preferred_element_type=jnp.float32)
    y = jnp.maximum(y + b1_ref[...], 0.0)     # (C, L) f32

    # 1x1 conv + folded BN2: second MXU pass.
    z = jnp.dot(w2_ref[...], y.astype(jnp.bfloat16),
                preferred_element_type=jnp.float32)

    # Residual add with the resident original x; lane-dense unmasked store.
    out_ref[0] = (x + z + b2_ref[...]).astype(out_ref.dtype)


def _kernel_iota_masks(x_ref, w1_ref, b1_ref, w2_ref, b2_ref, out_ref, *,
                       width, period):
    """Border masks computed in-kernel from a lane iota -- no mask is DMA'd.

    Requires `width` and `period` (= H*W) to be powers of two so the mod
    reduces to a bitwise AND (the VPU has no vector integer divide).
    """
    L = x_ref.shape[-1]
    idx = lax.broadcasted_iota(jnp.int32, (1, L), 1)
    # Pixel index within its own image (the lane axis may hold several images
    # when the batch is folded onto lanes) and column index within its row.
    pix = idx if L == period else jnp.bitwise_and(idx, period - 1)
    col = jnp.bitwise_and(pix, width - 1)

    def get_mask(t, dy, dx):
        conds = []
        if dy == -1:
            conds.append(pix >= width)               # not in the top row
        elif dy == 1:
            conds.append(pix < period - width)       # not in the bottom row
        if dx == -1:
            conds.append(col >= 1)                   # not in the left column
        elif dx == 1:
            conds.append(col < width - 1)            # not in the right column
        if not conds:
            return None
        m = conds[0]
        for c in conds[1:]:
            m = jnp.logical_and(m, c)
        return m

    _residual_body(x_ref, w1_ref, b1_ref, w2_ref, b2_ref, out_ref, get_mask,
                   width=width)


def _kernel_operand_masks(x_ref, w1_ref, b1_ref, w2_ref, b2_ref, mask_ref,
                          out_ref, *, width):
    """Fallback for non-power-of-two spatial dims: compact (9, L) f32 mask
    operand, broadcast over channels inside the kernel (never (9C, L))."""
    m_all = mask_ref[...] > 0.5                       # (9, L) bool

    def get_mask(t, dy, dx):
        if dy == 0 and dx == 0:
            return None
        return m_all[t:t + 1, :]

    _residual_body(x_ref, w1_ref, b1_ref, w2_ref, b2_ref, out_ref, get_mask,
                   width=width)


def _is_pow2(n):
    return n > 0 and (n & (n - 1)) == 0


def _compact_tap_masks(H, W, reps):
    """(9, reps*H*W) f32 0/1 masks: tap (dy,dx) valid at pixel (y,x)."""
    ys, xs = np.divmod(np.arange(H * W), W)
    rows = []
    for dy in (-1, 0, 1):
        for dx in (-1, 0, 1):
            rows.append((ys + dy >= 0) & (ys + dy < H) &
                        (xs + dx >= 0) & (xs + dx < W))
    return np.tile(np.stack(rows, 0).astype(np.float32), (1, reps))


@functools.partial(jax.jit, static_argnames=("fold_batch",))
def residual_forward(x_nchw, params, *, fold_batch=None):
    """Pallas implementation of Residual.forward.  Input/output are NCHW f32."""
    w1_t, w2_t, g1, be1, m1, v1, g2, be2, m2, v2 = params
    B, C, H, W = x_nchw.shape
    HW = H * W

    # ---- BatchNorm (inference) folding: scale -> weights, shift -> bias ------
    inv1 = g1 / jnp.sqrt(v1 + EPS)
    inv2 = g2 / jnp.sqrt(v2 + EPS)
    b1 = (be1 - m1 * inv1).reshape(C, 1).astype(jnp.float32)
    b2 = (be2 - m2 * inv2).reshape(C, 1).astype(jnp.float32)
    # torch (Cout, Cin, kH, kW) -> (Cout, (ky, kx, Cin)) im2col layout.
    # MXU note: M = Cout = C only fills the systolic array for C >= 128; keep
    # C a multiple of 16 (bf16 sublane tile) and lane extents multiples of 128.
    w1mat = jnp.transpose(w1_t, (0, 2, 3, 1)).reshape(C, 9 * C)
    w1mat = (w1mat * inv1[:, None]).astype(jnp.bfloat16)
    w2mat = (w2_t[:, :, 0, 0] * inv2[:, None]).astype(jnp.bfloat16)

    # ---- layout: channels on sublanes, flattened pixels on lanes -------------
    # Small problems: fold the batch onto the lane axis -> one grid step with
    # N = B*HW lanes (v5e/v6e have one TensorCore, so a B-step grid only adds
    # per-step overhead).  Larger problems: per-image "parallel" grid so both
    # v7x TensorCores get work.
    if fold_batch is None:
        fold_batch = B * HW <= 4096
    if fold_batch:
        x_in = jnp.transpose(x_nchw, (1, 0, 2, 3)).reshape(1, C, B * HW)
        G, L = 1, B * HW
    else:
        x_in = x_nchw.reshape(B, C, HW)            # free NCHW view
        G, L = B, HW
    x_in = x_in.astype(jnp.float32)

    args = [x_in, w1mat, b1, w2mat, b2]
    in_specs = [
        pl.BlockSpec((1, C, L), lambda b: (b, 0, 0)),
        # Constant-index operands (tiny).  For production sizes, single-buffer
        # them with pipeline_mode=pl.Buffered(1) to reclaim the dead VMEM.
        pl.BlockSpec((C, 9 * C), lambda b: (0, 0)),
        pl.BlockSpec((C, 1), lambda b: (0, 0)),
        pl.BlockSpec((C, C), lambda b: (0, 0)),
        pl.BlockSpec((C, 1), lambda b: (0, 0)),
    ]
    if _is_pow2(W) and _is_pow2(HW):
        kernel = functools.partial(_kernel_iota_masks, width=W, period=HW)
    else:
        # Non-power-of-two spatial dims: compact (9, L) mask operand instead
        # of in-kernel iota math (still ~C x smaller than the old (9C, L)).
        args.append(jnp.asarray(_compact_tap_masks(H, W, reps=L // HW)))
        in_specs.append(pl.BlockSpec((9, L), lambda b: (0, 0)))
        kernel = functools.partial(_kernel_operand_masks, width=W)

    # ---- scheduling hints -----------------------------------------------------
    flops = 2 * B * HW * (9 * C * C + C * C)       # the two MXU passes
    bytes_accessed = 2 * B * C * HW * 4 + 10 * C * C * 2
    cost = pl.CostEstimate(flops=flops, transcendentals=0,
                           bytes_accessed=bytes_accessed)

    vmem_need = (
        2 * 2 * C * L * 4          # x + out blocks, double-buffered
        + 2 * 10 * C * C * 2       # w1 + w2 (bf16), double-buffered
        + 4 * 8 * 128 * 4          # b1/b2 blocks (lane-padded)
        + 9 * C * L * 2            # bf16 im2col patches
        + 4 * C * L * 4            # f32 temporaries (h, rolled tap, y, z)
        + 16 * L                   # iota / masks
    )
    vmem_limit = int(min(max(1.5 * vmem_need, 32 * 2 ** 20), 64 * 2 ** 20))

    out = pl.pallas_call(
        kernel,
        out_shape=jax.ShapeDtypeStruct((G, C, L), jnp.float32),
        grid=(G,),
        in_specs=in_specs,
        out_specs=pl.BlockSpec((1, C, L), lambda b: (b, 0, 0)),
        input_output_aliases={0: 0},               # output reuses x's HBM buffer
        cost_estimate=cost,
        compiler_params=pltpu.CompilerParams(
            dimension_semantics=("parallel",),
            vmem_limit_bytes=vmem_limit),
    )(*args)

    if fold_batch:
        return jnp.transpose(out.reshape(C, B, H, W), (1, 0, 2, 3))
    return out.reshape(B, C, H, W)


def residual_reference(x_nchw, params):
    """Pure-XLA f32 reference with PyTorch NCHW/OIHW conventions."""
    w1_t, w2_t, g1, be1, m1, v1, g2, be2, m2, v2 = params
    dn = ("NCHW", "OIHW", "NCHW")

    h = jnp.maximum(x_nchw, 0.0)
    h = lax.conv_general_dilated(h, w1_t, (1, 1), ((1, 1), (1, 1)),
                                 dimension_numbers=dn)
    h = (h - m1[None, :, None, None]) / jnp.sqrt(v1[None, :, None, None] + EPS)
    h = h * g1[None, :, None, None] + be1[None, :, None, None]
    h = jnp.maximum(h, 0.0)
    h = lax.conv_general_dilated(h, w2_t, (1, 1), ((0, 0), (0, 0)),
                                 dimension_numbers=dn)
    h = (h - m2[None, :, None, None]) / jnp.sqrt(v2[None, :, None, None] + EPS)
    h = h * g2[None, :, None, None] + be2[None, :, None, None]
    return x_nchw + h


def make_params(key, channels):
    ks = jax.random.split(key, 8)
    C = channels
    # Conv weights (PyTorch shapes): (Cout, Cin, kH, kW)
    w1 = jax.random.normal(ks[0], (C, C, 3, 3), jnp.float32) * (1.0 / (3.0 * C) ** 0.5)
    w2 = jax.random.normal(ks[1], (C, C, 1, 1), jnp.float32) * (1.0 / C ** 0.5)
    # BatchNorm (inference-mode) parameters, deterministic & nontrivial
    g1 = 1.0 + 0.1 * jax.random.normal(ks[2], (C,), jnp.float32)
    be1 = 0.1 * jax.random.normal(ks[3], (C,), jnp.float32)
    m1 = 0.1 * jax.random.normal(ks[4], (C,), jnp.float32)
    v1 = 1.0 + 0.1 * jax.nn.sigmoid(jax.random.normal(ks[5], (C,), jnp.float32))
    g2 = 1.0 + 0.1 * jax.random.normal(ks[6], (C,), jnp.float32)
    be2 = 0.1 * jax.random.normal(ks[7], (C,), jnp.float32)
    m2 = 0.05 * jnp.arange(C, dtype=jnp.float32) / max(C - 1, 1)
    v2 = 1.0 + 0.05 * jnp.arange(C, dtype=jnp.float32) / max(C - 1, 1)
    return (w1, w2, g1, be1, m1, v1, g2, be2, m2, v2)


if __name__ == "__main__":
    B, C, H, W = 2, 16, 16, 16
    key = jax.random.PRNGKey(0)
    kx, kp = jax.random.split(key)
    x = jax.random.normal(kx, (B, C, H, W), jnp.float32)
    params = make_params(kp, C)

    ref = jax.block_until_ready(residual_reference(x, params))

    # Folded-batch path (single grid step; what small problems use).
    out = jax.block_until_ready(residual_forward(x, params))
    assert out.shape == (B, C, H, W)
    err = float(jnp.max(jnp.abs(out - ref)))
    # Tolerance relaxed vs the f32 reference because matmul operands are bf16
    # (f32 accumulation); error stays ~1e-2.
    assert jnp.allclose(out, ref, rtol=5e-2, atol=5e-2), f"fold path max|diff|={err}"

    # Per-image "parallel" grid path (v7x megacore / larger batches).
    out2 = jax.block_until_ready(residual_forward(x, params, fold_batch=False))
    err2 = float(jnp.max(jnp.abs(out2 - ref)))
    assert jnp.allclose(out2, ref, rtol=5e-2, atol=5e-2), f"grid path max|diff|={err2}"

    print("KERNEL_OK")
</pallas_src>

<mosaic_0001>
module attributes {stable_mosaic.version = 11 : i64} {
  func.func @_kernel_iota_masks(%arg0: i32, %arg1: memref<1x16x512xf32, #tpu.memory_space<vmem>>, %arg2: memref<16x144xbf16, #tpu.memory_space<vmem>>, %arg3: memref<16x1xf32, #tpu.memory_space<vmem>>, %arg4: memref<16x16xbf16, #tpu.memory_space<vmem>>, %arg5: memref<16x1xf32, #tpu.memory_space<vmem>>, %arg6: memref<1x16x512xf32, #tpu.memory_space<vmem>>) attributes {dimension_semantics = [#tpu.dimension_semantics<parallel>], iteration_bounds = array<i64: 1>, scalar_prefetch = 0 : i64, scratch_operands = 0 : i64, tpu.core_type = #tpu.core_type<tc>, window_params = [{transform_indices = @transform_0, window_bounds = array<i64: 1, 16, 512>}, {pipeline_mode = #tpu.pipeline_mode<synchronous>, transform_indices = @transform_1, window_bounds = array<i64: 16, 144>}, {pipeline_mode = #tpu.pipeline_mode<synchronous>, transform_indices = @transform_2, window_bounds = array<i64: 16, 1>}, {pipeline_mode = #tpu.pipeline_mode<synchronous>, transform_indices = @transform_3, window_bounds = array<i64: 16, 16>}, {pipeline_mode = #tpu.pipeline_mode<synchronous>, transform_indices = @transform_4, window_bounds = array<i64: 16, 1>}, {transform_indices = @transform_5, window_bounds = array<i64: 1, 16, 512>}]} {
    %0 = tpu.iota {dimensions = array<i32: 1>} : vector<1x512xi32>
    %c255_i32 = arith.constant 255 : i32
    %1 = vector.broadcast %c255_i32 : i32 to vector<1x512xi32>
    %2 = arith.andi %0, %1 : vector<1x512xi32>
    %c15_i32 = arith.constant 15 : i32
    %3 = vector.broadcast %c15_i32 : i32 to vector<1x512xi32>
    %4 = arith.andi %2, %3 : vector<1x512xi32>
    %c0 = arith.constant 0 : index
    %c0_0 = arith.constant 0 : index
    %c0_1 = arith.constant 0 : index
    %5 = vector.load %arg1[%c0, %c0_0, %c0_1] : memref<1x16x512xf32, #tpu.memory_space<vmem>>, vector<1x16x512xf32>
    %6 = vector.shape_cast %5 : vector<1x16x512xf32> to vector<16x512xf32>
    %cst = arith.constant 0.000000e+00 : f32
    %7 = vector.broadcast %cst : f32 to vector<16x512xf32>
    %8 = arith.maximumf %6, %7 : vector<16x512xf32>
    %c17_i32 = arith.constant 17 : i32
    %9 = tpu.dynamic_rotate %8 by %c17_i32 dim 1 : vector<16x512xf32>, i32 -> vector<16x512xf32>
    %c16_i32 = arith.constant 16 : i32
    %10 = vector.broadcast %c16_i32 : i32 to vector<1x512xi32>
    %11 = arith.cmpi sge, %2, %10 : vector<1x512xi32>
    %c1_i32 = arith.constant 1 : i32
    %12 = vector.broadcast %c1_i32 : i32 to vector<1x512xi32>
    %13 = arith.cmpi sge, %4, %12 : vector<1x512xi32>
    %14 = arith.andi %11, %13 : vector<1x512xi1>
    %cst_2 = arith.constant 0.000000e+00 : f32
    %15 = vector.shape_cast %14 : vector<1x512xi1> to vector<1x512xi1>
    %16 = vector.broadcast %15 : vector<1x512xi1> to vector<16x512xi1>
    %17 = vector.broadcast %cst_2 : f32 to vector<16x512xf32>
    %18 = arith.select %16, %9, %17 : vector<16x512xi1>, vector<16x512xf32>
    %19 = arith.truncf %18 : vector<16x512xf32> to vector<16x512xbf16>
    %c16_i32_3 = arith.constant 16 : i32
    %20 = tpu.dynamic_rotate %8 by %c16_i32_3 dim 1 : vector<16x512xf32>, i32 -> vector<16x512xf32>
    %c16_i32_4 = arith.constant 16 : i32
    %21 = vector.broadcast %c16_i32_4 : i32 to vector<1x512xi32>
    %22 = arith.cmpi sge, %2, %21 : vector<1x512xi32>
    %cst_5 = arith.constant 0.000000e+00 : f32
    %23 = vector.shape_cast %22 : vector<1x512xi1> to vector<1x512xi1>
    %24 = vector.broadcast %23 : vector<1x512xi1> to vector<16x512xi1>
    %25 = vector.broadcast %cst_5 : f32 to vector<16x512xf32>
    %26 = arith.select %24, %20, %25 : vector<16x512xi1>, vector<16x512xf32>
    %27 = arith.truncf %26 : vector<16x512xf32> to vector<16x512xbf16>
    %c15_i32_6 = arith.constant 15 : i32
    %28 = tpu.dynamic_rotate %8 by %c15_i32_6 dim 1 : vector<16x512xf32>, i32 -> vector<16x512xf32>
    %c16_i32_7 = arith.constant 16 : i32
    %29 = vector.broadcast %c16_i32_7 : i32 to vector<1x512xi32>
    %30 = arith.cmpi sge, %2, %29 : vector<1x512xi32>
    %c15_i32_8 = arith.constant 15 : i32
    %31 = vector.broadcast %c15_i32_8 : i32 to vector<1x512xi32>
    %32 = arith.cmpi slt, %4, %31 : vector<1x512xi32>
    %33 = arith.andi %30, %32 : vector<1x512xi1>
    %cst_9 = arith.constant 0.000000e+00 : f32
    %34 = vector.shape_cast %33 : vector<1x512xi1> to vector<1x512xi1>
    %35 = vector.broadcast %34 : vector<1x512xi1> to vector<16x512xi1>
    %36 = vector.broadcast %cst_9 : f32 to vector<16x512xf32>
    %37 = arith.select %35, %28, %36 : vector<16x512xi1>, vector<16x512xf32>
    %38 = arith.truncf %37 : vector<16x512xf32> to vector<16x512xbf16>
    %c1_i32_10 = arith.constant 1 : i32
    %39 = tpu.dynamic_rotate %8 by %c1_i32_10 dim 1 : vector<16x512xf32>, i32 -> vector<16x512xf32>
    %c1_i32_11 = arith.constant 1 : i32
    %40 = vector.broadcast %c1_i32_11 : i32 to vector<1x512xi32>
    %41 = arith.cmpi sge, %4, %40 : vector<1x512xi32>
    %cst_12 = arith.constant 0.000000e+00 : f32
    %42 = vector.shape_cast %41 : vector<1x512xi1> to vector<1x512xi1>
    %43 = vector.broadcast %42 : vector<1x512xi1> to vector<16x512xi1>
    %44 = vector.broadcast %cst_12 : f32 to vector<16x512xf32>
    %45 = arith.select %43, %39, %44 : vector<16x512xi1>, vector<16x512xf32>
    %46 = arith.truncf %45 : vector<16x512xf32> to vector<16x512xbf16>
    %47 = arith.truncf %8 : vector<16x512xf32> to vector<16x512xbf16>
    %c511_i32 = arith.constant 511 : i32
    %48 = tpu.dynamic_rotate %8 by %c511_i32 dim 1 : vector<16x512xf32>, i32 -> vector<16x512xf32>
    %c15_i32_13 = arith.constant 15 : i32
    %49 = vector.broadcast %c15_i32_13 : i32 to vector<1x512xi32>
    %50 = arith.cmpi slt, %4, %49 : vector<1x512xi32>
    %cst_14 = arith.constant 0.000000e+00 : f32
    %51 = vector.shape_cast %50 : vector<1x512xi1> to vector<1x512xi1>
    %52 = vector.broadcast %51 : vector<1x512xi1> to vector<16x512xi1>
    %53 = vector.broadcast %cst_14 : f32 to vector<16x512xf32>
    %54 = arith.select %52, %48, %53 : vector<16x512xi1>, vector<16x512xf32>
    %55 = arith.truncf %54 : vector<16x512xf32> to vector<16x512xbf16>
    %c497_i32 = arith.constant 497 : i32
    %56 = tpu.dynamic_rotate %8 by %c497_i32 dim 1 : vector<16x512xf32>, i32 -> vector<16x512xf32>
    %c240_i32 = arith.constant 240 : i32
    %57 = vector.broadcast %c240_i32 : i32 to vector<1x512xi32>
    %58 = arith.cmpi slt, %2, %57 : vector<1x512xi32>
    %c1_i32_15 = arith.constant 1 : i32
    %59 = vector.broadcast %c1_i32_15 : i32 to vector<1x512xi32>
    %60 = arith.cmpi sge, %4, %59 : vector<1x512xi32>
    %61 = arith.andi %58, %60 : vector<1x512xi1>
    %cst_16 = arith.constant 0.000000e+00 : f32
    %62 = vector.shape_cast %61 : vector<1x512xi1> to vector<1x512xi1>
    %63 = vector.broadcast %62 : vector<1x512xi1> to vector<16x512xi1>
    %64 = vector.broadcast %cst_16 : f32 to vector<16x512xf32>
    %65 = arith.select %63, %56, %64 : vector<16x512xi1>, vector<16x512xf32>
    %66 = arith.truncf %65 : vector<16x512xf32> to vector<16x512xbf16>
    %c496_i32 = arith.constant 496 : i32
    %67 = tpu.dynamic_rotate %8 by %c496_i32 dim 1 : vector<16x512xf32>, i32 -> vector<16x512xf32>
    %c240_i32_17 = arith.constant 240 : i32
    %68 = vector.broadcast %c240_i32_17 : i32 to vector<1x512xi32>
    %69 = arith.cmpi slt, %2, %68 : vector<1x512xi32>
    %cst_18 = arith.constant 0.000000e+00 : f32
    %70 = vector.shape_cast %69 : vector<1x512xi1> to vector<1x512xi1>
    %71 = vector.broadcast %70 : vector<1x512xi1> to vector<16x512xi1>
    %72 = vector.broadcast %cst_18 : f32 to vector<16x512xf32>
    %73 = arith.select %71, %67, %72 : vector<16x512xi1>, vector<16x512xf32>
    %74 = arith.truncf %73 : vector<16x512xf32> to vector<16x512xbf16>
    %c495_i32 = arith.constant 495 : i32
    %75 = tpu.dynamic_rotate %8 by %c495_i32 dim 1 : vector<16x512xf32>, i32 -> vector<16x512xf32>
    %c240_i32_19 = arith.constant 240 : i32
    %76 = vector.broadcast %c240_i32_19 : i32 to vector<1x512xi32>
    %77 = arith.cmpi slt, %2, %76 : vector<1x512xi32>
    %c15_i32_20 = arith.constant 15 : i32
    %78 = vector.broadcast %c15_i32_20 : i32 to vector<1x512xi32>
    %79 = arith.cmpi slt, %4, %78 : vector<1x512xi32>
    %80 = arith.andi %77, %79 : vector<1x512xi1>
    %cst_21 = arith.constant 0.000000e+00 : f32
    %81 = vector.shape_cast %80 : vector<1x512xi1> to vector<1x512xi1>
    %82 = vector.broadcast %81 : vector<1x512xi1> to vector<16x512xi1>
    %83 = vector.broadcast %cst_21 : f32 to vector<16x512xf32>
    %84 = arith.select %82, %75, %83 : vector<16x512xi1>, vector<16x512xf32>
    %85 = arith.truncf %84 : vector<16x512xf32> to vector<16x512xbf16>
    %86 = tpu.concatenate %19, %27, %38, %46, %47, %55, %66, %74, %85 in 0 : vector<16x512xbf16>, vector<16x512xbf16>, vector<16x512xbf16>, vector<16x512xbf16>, vector<16x512xbf16>, vector<16x512xbf16>, vector<16x512xbf16>, vector<16x512xbf16>, vector<16x512xbf16> -> vector<144x512xbf16>
    %c0_22 = arith.constant 0 : index
    %c0_23 = arith.constant 0 : index
    %87 = vector.load %arg2[%c0_22, %c0_23] : memref<16x144xbf16, #tpu.memory_space<vmem>>, vector<16x144xbf16>
    %cst_24 = arith.constant dense<0.000000e+00> : vector<16x512xf32>
    %88 = tpu.matmul %87, %86, %cst_24 {dimension_numbers = #tpu.dot_dimension_numbers<[1], [0], [0], [1], [0, 0, 1, 1], [], []>} : vector<16x144xbf16>, vector<144x512xbf16>, vector<16x512xf32> -> vector<16x512xf32>
    %c0_25 = arith.constant 0 : index
    %c0_26 = arith.constant 0 : index
    %89 = vector.load %arg3[%c0_25, %c0_26] : memref<16x1xf32, #tpu.memory_space<vmem>>, vector<16x1xf32>
    %90 = vector.broadcast %89 : vector<16x1xf32> to vector<16x512xf32>
    %91 = arith.addf %88, %90 : vector<16x512xf32>
    %cst_27 = arith.constant 0.000000e+00 : f32
    %92 = vector.broadcast %cst_27 : f32 to vector<16x512xf32>
    %93 = arith.maximumf %91, %92 : vector<16x512xf32>
    %c0_28 = arith.constant 0 : index
    %c0_29 = arith.constant 0 : index
    %94 = vector.load %arg4[%c0_28, %c0_29] : memref<16x16xbf16, #tpu.memory_space<vmem>>, vector<16x16xbf16>
    %95 = arith.truncf %93 : vector<16x512xf32> to vector<16x512xbf16>
    %cst_30 = arith.constant dense<0.000000e+00> : vector<16x512xf32>
    %96 = tpu.matmul %94, %95, %cst_30 {dimension_numbers = #tpu.dot_dimension_numbers<[1], [0], [0], [1], [0, 0, 1, 1], [], []>} : vector<16x16xbf16>, vector<16x512xbf16>, vector<16x512xf32> -> vector<16x512xf32>
    %97 = arith.addf %6, %96 : vector<16x512xf32>
    %c0_31 = arith.constant 0 : index
    %c0_32 = arith.constant 0 : index
    %98 = vector.load %arg5[%c0_31, %c0_32] : memref<16x1xf32, #tpu.memory_space<vmem>>, vector<16x1xf32>
    %99 = vector.broadcast %98 : vector<16x1xf32> to vector<16x512xf32>
    %100 = arith.addf %97, %99 : vector<16x512xf32>
    %c0_33 = arith.constant 0 : index
    %c0_34 = arith.constant 0 : index
    %c0_35 = arith.constant 0 : index
    %101 = vector.load %arg6[%c0_33, %c0_34, %c0_35] : memref<1x16x512xf32, #tpu.memory_space<vmem>>, vector<1x16x512xf32>
    %102 = vector.shape_cast %101 : vector<1x16x512xf32> to vector<16x512xf32>
    %103 = vector.shape_cast %100 : vector<16x512xf32> to vector<1x16x512xf32>
    tpu.vector_store %arg6[%c0_33, %c0_34, %c0_35], %103 {strides = array<i32>} : memref<1x16x512xf32, #tpu.memory_space<vmem>>, vector<1x16x512xf32>,
    return
  }
  func.func @transform_0(%arg0: i32) -> (i32, i32, i32) {
    %c0_i32 = arith.constant 0 : i32
    %c0_i32_0 = arith.constant 0 : i32
    %c0_i32_1 = arith.constant 0 : i32
    return %arg0, %c0_i32, %c0_i32_0 : i32, i32, i32
  }
  func.func @transform_1(%arg0: i32) -> (i32, i32) {
    %c0_i32 = arith.constant 0 : i32
    %c0_i32_0 = arith.constant 0 : i32
    %c0_i32_1 = arith.constant 0 : i32
    return %c0_i32, %c0_i32_0 : i32, i32
  }
  func.func @transform_2(%arg0: i32) -> (i32, i32) {
    %c0_i32 = arith.constant 0 : i32
    %c0_i32_0 = arith.constant 0 : i32
    %c0_i32_1 = arith.constant 0 : i32
    return %c0_i32, %c0_i32_0 : i32, i32
  }
  func.func @transform_3(%arg0: i32) -> (i32, i32) {
    %c0_i32 = arith.constant 0 : i32
    %c0_i32_0 = arith.constant 0 : i32
    %c0_i32_1 = arith.constant 0 : i32
    return %c0_i32, %c0_i32_0 : i32, i32
  }
  func.func @transform_4(%arg0: i32) -> (i32, i32) {
    %c0_i32 = arith.constant 0 : i32
    %c0_i32_0 = arith.constant 0 : i32
    %c0_i32_1 = arith.constant 0 : i32
    return %c0_i32, %c0_i32_0 : i32, i32
  }
  func.func @transform_5(%arg0: i32) -> (i32, i32, i32) {
    %c0_i32 = arith.constant 0 : i32
    %c0_i32_0 = arith.constant 0 : i32
    %c0_i32_1 = arith.constant 0 : i32
    return %arg0, %c0_i32, %c0_i32_0 : i32, i32, i32
  }
}

</mosaic_0001>

<bundles_post_ra>
// kernel: residual_forward.1
= control target key start
LH: loop header
LB: loop body
LE: loop exit
PB: predicated region body
PF: predicated region fallthrough
CT: control target
= control target key end

     0   :  { %s1086_s30 = smov 112   ;;  %s1087_s6 = smov 113   ;;  %v21_v21 = vlaneseq  ;;  %s1911_s0 = inlined_call_operand.vmem [shape: f32[1,16,512], index: 0, kind: input, shape index: {}, may-alias: {0,5}]   ;;  %s1912_s1 = inlined_call_operand.vmem [shape: bf16[16,144], index: 1, kind: input, shape index: {}]   ;;  %s1913_s2 = inlined_call_operand.vmem [shape: f32[16,1], index: 2, kind: input, shape index: {}]   ;;  %s1914_s4 = inlined_call_operand.vmem [shape: f32[16,1], index: 4, kind: input, shape index: {}]   ;;  %s1915_s3 = inlined_call_operand.vmem [shape: bf16[16,16], index: 3, kind: input, shape index: {}]   ;;  %s1916_s5 = inlined_call_operand.vmem [shape: f32[1,16,512], index: 5, kind: output, shape index: {}, may-alias: {0,5}]  }
   0x1   :  { %v1128_v0 = vld [vmem:[%s1911_s0 + $0x8] sm:$0xff]  ;;  %v1138_v2 = vld [vmem:[%s1911_s0] sm:$0xff]  ;;  %v1152_v8 = vld [vmem:[%s1911_s0 + $0x10] sm:$0xff]  ;;  %s1088_s7 = smov 111   ;;  %s1089_s12 = smov 127  }
   0x2   :  { %v1133_v1 = vld [vmem:[%s1911_s0 + $0x28] sm:$0xff]  ;;  %v43_v3 = vmax.f32 %v1128_v0, 0.0  ;;  %v1145_v5 = vld [vmem:[%s1911_s0 + $0x20] sm:$0xff]  ;;  %v42_v6 = vmax.f32 %v1138_v2, 0.0  ;;  %v1157_v9 = vld [vmem:[%s1911_s0 + $0x30] sm:$0xff]  ;;  %v44_v12 = vmax.f32 %v1152_v8, 0.0 }
   0x3   :  { %v47_v4 = vmax.f32 %v1133_v1, 0.0  ;;  %v46_v7 = vmax.f32 %v1145_v5, 0.0  ;;  %v1919_v13 = vmax.f32 %v1157_v9, 0.0  ;;  %v1176_v15 = vld [vmem:[%s1911_s0 + $0x18] sm:$0xff]  ;;  %s1090_s13 = smov 1   ;;  %s1091_s14 = smov 15  }
   0x4   :  { %v1181_v16 = vld [vmem:[%s1911_s0 + $0x38] sm:$0xff]  ;;  %v45_v17 = vmax.f32 %v1176_v15, 0.0  ;;  %s1092_s15 = smov 16   ;;  %s1093_s16 = smov 17   ;;  %v1191_v23 = vand.u32 127, %v21_v21 }
   0x5   :  { %v915_v10 = vpack.i.bf16 %v47_v4, %v43_v3  ;;  %v925_v11 = vpack.i.bf16 %v46_v7, %v42_v6  ;;  %v920_v14 = vpack.i.bf16 %v1919_v13, %v44_v12  ;;  %v1918_v18 = vmax.f32 %v1181_v16, 0.0 }
   0x6   :  { %v23_v24 = vadd.s32 128, %v1191_v23  ;;  %v26_v30 = vand.u32 255, %v1191_v23  ;;  %vm315_vm0 = vcmp.lt.s32.totalorder %v1191_v23, 113  ;;  %v1212_v37 = vadd.s32 256, %v1191_v23 }
   0x7   :  { %916 = vrot.lane.b32.xlu0 %v915_v10, %s1086_s30  ;;  %936 = vrot.lane.b32.xlu2 %v915_v10, %s1087_s6  ;;  %v975_v19 = vpack.i.bf16 %v1918_v18, %v45_v17  ;;  %vm368_vm4 = vcmp.lt.s32.totalorder %v1191_v23, 112  ;;  %v1236_v42 = vadd.s32 384, %v1191_v23  ;;  %vm413_vm7 = vcmp.lt.s32.totalorder %v1191_v23, 111 }
   0x8   :  { %926 = vrot.lane.b32.xlu1 %v925_v11, %s1086_s30  ;;  %v27_v26 = vand.u32 255, %v23_v24  ;;  %v1216_v38 = vand.u32 15, %v26_v30  ;;  %v1917_v43 = vand.u32 255, %v1212_v37  ;;  %vm270_vm9 = vcmp.lt.s32.totalorder %v1191_v23, 127 }
   0x9   :  { %v29_v58 = vand.u32 255, %v1236_v42 }
   0xa   :  { %v1196_v27 = vand.u32 15, %v27_v26  ;;  %vm1206_vm1 = vcmp.lt.s32.totalorder %v27_v26, 240  ;;  %vm79_vm5 = vcmp.ge.s32.totalorder %v1216_v38, 1  ;;  %vm177_vm8 = vcmp.lt.s32.totalorder %v1216_v38, 15 }
   0xb   :  { %v1263_v59 = vand.u32 15, %v1917_v43  ;;  %vm1367_vm13 = vcmp.lt.s32.totalorder %v29_v58, 240 }
   0xc   :  { %vm80_vm2 = vcmp.ge.s32.totalorder %v1196_v27, 1  ;;  %vm178_vm6 = vcmp.lt.s32.totalorder %v1196_v27, 15 }
   0xd   :  { %vm1230_vm3 = vmand %vm1206_vm1, %vm80_vm2  ;;  %vm179_vm10 = vcmp.lt.s32.totalorder %v1263_v59, 15  ;;  %vm81_vm15 = vcmp.ge.s32.totalorder %v1263_v59, 1 }
   0xe   :  { %vm1313_vm11 = vmand %vm1206_vm1, %vm178_vm6 }
   0xf   :  { %921 = vrot.lane.b32.xlu0 %v920_v14, %s1086_s30  ;;  %941 = vrot.lane.b32.xlu2 %v920_v14, %s1087_s6 }
  0x10   :  { %931 = vrot.lane.b32.xlu1 %v925_v11, %s1087_s6 }
  0x17   :  { %946 = vrot.lane.b32.xlu0 %v925_v11, %s1088_s7  ;;  %956 = vrot.lane.b32.xlu2 %v920_v14, %s1088_s7 }
  0x18   :  { %951 = vrot.lane.b32.xlu1 %v915_v10, %s1088_s7 }
  0x1f   :  { %961 = vrot.lane.b32.xlu0 %v925_v11, %s1089_s12  ;;  %971 = vrot.lane.b32.xlu2 %v920_v14, %s1089_s12 }
  0x20   :  { %966 = vrot.lane.b32.xlu1 %v915_v10, %s1089_s12 }
  0x27   :  { %976 = vrot.lane.b32.xlu0 %v975_v19, %s1086_s30  ;;  %986 = vrot.lane.b32.xlu2 %v925_v11, %s1090_s13 }
  0x28   :  { %981 = vrot.lane.b32.xlu1 %v975_v19, %s1087_s6 }
  0x2f   :  { %991 = vrot.lane.b32.xlu0 %v915_v10, %s1090_s13  ;;  %1001 = vrot.lane.b32.xlu2 %v975_v19, %s1089_s12 }
  0x30   :  { %996 = vrot.lane.b32.xlu1 %v975_v19, %s1090_s13 }
  0x37   :  { %1006 = vrot.lane.b32.xlu0 %v925_v11, %s1091_s14  ;;  %1016 = vrot.lane.b32.xlu2 %v975_v19, %s1091_s14 }
  0x38   :  { %1011 = vrot.lane.b32.xlu1 %v915_v10, %s1091_s14 }
  0x3f   :  { %1021 = vrot.lane.b32.xlu0 %v975_v19, %s1088_s7  ;;  %1031 = vrot.lane.b32.xlu2 %v975_v19, %s1092_s15 }
  0x40   :  { %1026 = vrot.lane.b32.xlu1 %v925_v11, %s1092_s15 }
  0x47   :  { %1036 = vrot.lane.b32.xlu0 %v915_v10, %s1092_s15  ;;  %1046 = vrot.lane.b32.xlu2 %v925_v11, %s1093_s16 }
  0x48   :  { %1041 = vrot.lane.b32.xlu1 %v920_v14, %s1090_s13 }
  0x4f   :  { %1051 = vrot.lane.b32.xlu0 %v915_v10, %s1093_s16  ;;  %1061 = vrot.lane.b32.xlu2 %v920_v14, %s1091_s14 }
  0x50   :  { %1056 = vrot.lane.b32.xlu1 %v975_v19, %s1093_s16 }
  0x57   :  { %1066 = vrot.lane.b32.xlu0 %v920_v14, %s1092_s15 }
  0x58   :  { %1071 = vrot.lane.b32.xlu1 %v920_v14, %s1093_s16 }
  0x61   :  { %v937_v20 = vpop.permute.xlu2 %936 }
  0x62   :  { %v939_v31 = vunpack.i.h.bf16 %v937_v20  ;;  %v938_v32 = vunpack.i.l.bf16 %v937_v20 }
  0x69   :  { %v1189_v22 = vpop.permute.xlu2 %941 }
  0x6a   :  { %v944_v33 = vunpack.i.h.bf16 %v1189_v22  ;;  %v943_v34 = vunpack.i.l.bf16 %v1189_v22 }
  0x6c   :  { %v318_v39 = vsel %vm315_vm0, %v938_v32, %v943_v34  ;;  %v319_v40 = vsel %vm315_vm0, %v939_v31, %v944_v33 }
  0x6d   :  { %v341_v50 = vsel %vm1230_vm3, %v318_v39, 0.0  ;;  %v345_v51 = vsel %vm1230_vm3, %v319_v40, 0.0  ;;  %v1301_v39 = vand.u32 15, %v29_v58 }
  0x6f   :  { %vm180_vm12 = vcmp.lt.s32.totalorder %v1301_v39, 15  ;;  %vm82_vm14 = vcmp.ge.s32.totalorder %v1301_v39, 1 }
  0x70   :  { %vm1436_vm3 = vmand %vm1367_vm13, %vm82_vm14 }
  0x71   :  { %v1194_v25 = vpop.permute.xlu2 %956 }
  0x72   :  { %v959_v52 = vunpack.i.h.bf16 %v1194_v25 }
  0x79   :  { %v917_v28 = vpop.permute.xlu0 %916  ;;  %v1198_v29 = vpop.permute.xlu2 %971 }
  0x7a   :  { %v1203_v35 = vpop.permute.xlu1 %926  ;;  %v919_v44 = vunpack.i.h.bf16 %v917_v28  ;;  %v918_v45 = vunpack.i.l.bf16 %v917_v28  ;;  %v958_v28 = vunpack.i.l.bf16 %v1194_v25  ;;  %v973_v18 = vunpack.i.l.bf16 %v1198_v29 }
  0x7b   :  { %v929_v46 = vunpack.i.h.bf16 %v1203_v35  ;;  %v928_v47 = vunpack.i.l.bf16 %v1203_v35 }
  0x7d   :  { %v373_v62 = vsel %vm368_vm4, %v928_v47, %v918_v45  ;;  %v374_v63 = vsel %vm368_vm4, %v929_v46, %v919_v44 }
  0x81   :  { %v1241_v48 = vpop.permute.xlu0 %921  ;;  %v1243_v49 = vpop.permute.xlu2 %986 }
  0x82   :  { %v924_v53 = vunpack.i.h.bf16 %v1241_v48  ;;  %v923_v54 = vunpack.i.l.bf16 %v1241_v48  ;;  %v1254_v55 = vpop.permute.xlu1 %931 }
  0x83   :  { %v934_v56 = vunpack.i.h.bf16 %v1254_v55  ;;  %v933_v57 = vunpack.i.l.bf16 %v1254_v55 }
  0x84   :  { %v371_v60 = vsel %vm368_vm4, %v918_v45, %v923_v54  ;;  %v372_v61 = vsel %vm368_vm4, %v919_v44, %v924_v53 }
  0x85   :  { %v321_v10 = vsel %vm315_vm0, %v934_v56, %v939_v31  ;;  %v320_v11 = vsel %vm315_vm0, %v933_v57, %v938_v32  ;;  %v386_v14 = vsel %vm1206_vm1, %v371_v60, 0.0  ;;  %v390_v19 = vsel %vm1206_vm1, %v372_v61, 0.0 }
  0x86   :  { %v393_v20 = vpack.c.bf16 %v386_v14, %v373_v62  ;;  %v395_v21 = vpack.c.bf16 %v390_v19, %v374_v63  ;;  %v340_v24 = vsel %vm79_vm5, %v320_v11, 0.0  ;;  %v344_v26 = vsel %vm79_vm5, %v321_v10, 0.0 }
  0x87   :  { %v348_v31 = vpack.c.bf16 %v341_v50, %v340_v24  ;;  %v350_v32 = vpack.c.bf16 %v345_v51, %v344_v26  ;;  %v974_v60 = vunpack.i.h.bf16 %v1198_v29  ;;  %vm221_vm1 = vcmp.lt.s32.totalorder %v1191_v23, 1 }
  0x88   :  { %v590_v40 = vunpack.c.l.b16 %v393_v20  ;;  %v594_v41 = vunpack.c.l.b16 %v395_v21  ;;  %v591_v44 = vunpack.c.h.b16 %v393_v20  ;;  %v595_v45 = vunpack.c.h.b16 %v395_v21 }
  0x89   :  { %v1304_v61 = vpop.permute.xlu0 %946  ;;  %v1002_v62 = vpop.permute.xlu2 %1001  ;;  %v570_v63 = vunpack.c.l.b16 %v348_v31  ;;  %v574_v11 = vunpack.c.l.b16 %v350_v32  ;;  %v571_v14 = vunpack.c.h.b16 %v348_v31  ;;  %v575_v19 = vunpack.c.h.b16 %v350_v32 }
  0x8a   :  { %v949_v50 = vunpack.i.h.bf16 %v1304_v61  ;;  %v948_v51 = vunpack.i.l.bf16 %v1304_v61  ;;  %v952_v10 = vpop.permute.xlu1 %951  ;;  %v598_v20 = vpack.c.b16 %v594_v41, %v590_v40  ;;  %v599_v21 = vpack.c.b16 %v595_v45, %v591_v44 }
  0x8b   :  { %v954_v24 = vunpack.i.h.bf16 %v952_v10  ;;  %v953_v26 = vunpack.i.l.bf16 %v952_v10  ;;  %v1004_v13 = vunpack.i.h.bf16 %v1002_v62  ;;  %v1322_v31 = vpack.c.bf16 %v43_v3, %v42_v6 }
  0x8c   :  { %v1328_v32 = vpack.c.bf16 %v47_v4, %v46_v7  ;;  %v1003_v36 = vunpack.i.l.bf16 %v1002_v62  ;;  %653 = vmatpush.bf16.msra.mxu0 %v598_v20  ;;  %681 = vmatpush.bf16.msra.mxu2 %v599_v21  ;;  %v578_v7 = vpack.c.b16 %v574_v11, %v570_v63  ;;  %v579_v40 = vpack.c.b16 %v575_v19, %v571_v14 }
  0x8d   :  { %v416_v2 = vsel %vm413_vm7, %v953_v26, %v958_v28  ;;  %v417_v0 = vsel %vm413_vm7, %v954_v24, %v959_v52  ;;  %v418_v1 = vsel %vm413_vm7, %v948_v51, %v953_v26  ;;  %v419_v3 = vsel %vm413_vm7, %v949_v50, %v954_v24 }
  0x8e   :  { %v434_v4 = vsel %vm177_vm8, %v418_v1, 0.0  ;;  %v435_v5 = vsel %vm1313_vm11, %v416_v2, 0.0  ;;  %v439_v6 = vsel %vm1313_vm11, %v417_v0, 0.0  ;;  %v438_v41 = vsel %vm177_vm8, %v419_v3, 0.0 }
  0x8f   :  { %v442_v44 = vpack.c.bf16 %v435_v5, %v434_v4  ;;  %v989_v45 = vunpack.i.h.bf16 %v1243_v49  ;;  %v988_v62 = vunpack.i.l.bf16 %v1243_v49  ;;  %v272_v10 = vsel %vm270_vm9, %v974_v60, %v1004_v13 }
  0x90   :  { %v444_v24 = vpack.c.bf16 %v439_v6, %v438_v41  ;;  %v271_v43 = vsel %vm270_vm9, %v973_v18, %v1003_v36  ;;  %654 = vmatpush.bf16.msra.mxu0 %v578_v7  ;;  %682 = vmatpush.bf16.msra.mxu2 %v579_v40  ;;  %v530_v19 = vunpack.c.l.b16 %v1322_v31  ;;  %v534_v26 = vunpack.c.l.b16 %v1328_v32 }
  0x91   :  { %v962_v63 = vpop.permute.xlu0 %961  ;;  %v1363_v11 = vpop.permute.xlu2 %1016  ;;  %v531_v20 = vunpack.c.h.b16 %v1322_v31  ;;  %v610_v1 = vunpack.c.l.b16 %v442_v44  ;;  %v611_v3 = vunpack.c.h.b16 %v442_v44  ;;  %v535_v40 = vunpack.c.h.b16 %v1328_v32 }
  0x92   :  { %v964_v21 = vunpack.i.h.bf16 %v962_v63  ;;  %v963_v2 = vunpack.i.l.bf16 %v962_v63  ;;  %v967_v0 = vpop.permute.xlu1 %966  ;;  %v614_v42 = vunpack.c.l.b16 %v444_v24  ;;  %v615_v58 = vunpack.c.h.b16 %v444_v24 }
  0x93   :  { %v969_v4 = vunpack.i.h.bf16 %v967_v0  ;;  %v968_v5 = vunpack.i.l.bf16 %v967_v0  ;;  %v289_v31 = vsel %vm179_vm10, %v271_v43, 0.0  ;;  %vm123_vm11 = vcmp.lt.s32.totalorder %v1191_v23, 16 }
  0x94   :  { %v278_v6 = vsel %vm270_vm9, %v1004_v13, %v964_v21  ;;  %v277_v7 = vsel %vm270_vm9, %v1003_v36, %v963_v2  ;;  %v618_v32 = vpack.c.b16 %v614_v42, %v610_v1  ;;  %v619_v24 = vpack.c.b16 %v615_v58, %v611_v3 }
  0x95   :  { %v274_v41 = vsel %vm270_vm9, %v969_v4, %v974_v60  ;;  %v276_v44 = vsel %vm270_vm9, %v964_v21, %v969_v4  ;;  %v273_v13 = vsel %vm270_vm9, %v968_v5, %v973_v18  ;;  %v275_v36 = vsel %vm270_vm9, %v963_v2, %v968_v5 }
  0x96   :  { %v287_v63 = vsel %vm177_vm8, %v275_v36, 0.0  ;;  %v288_v29 = vsel %vm178_vm6, %v273_v13, 0.0  ;;  %v291_v60 = vsel %vm177_vm8, %v276_v44, 0.0  ;;  %v292_v43 = vsel %vm178_vm6, %v274_v41, 0.0  ;;  %674 = vmatpush.bf16.msra.mxu1 %v618_v32  ;;  %702 = vmatpush.bf16.msra.mxu3 %v619_v24 }
  0x97   :  { %v295_v21 = vpack.c.bf16 %v288_v29, %v287_v63  ;;  %v290_v18 = vsel %vm180_vm12, %v277_v7, 0.0  ;;  %v1019_v2 = vunpack.i.h.bf16 %v1363_v11  ;;  %v297_v0 = vpack.c.bf16 %v292_v43, %v291_v60 }
  0x98   :  { %v1404_v1 = vpack.c.b16 %v534_v26, %v530_v19  ;;  %v293_v3 = vsel %vm179_vm10, %v272_v10, 0.0  ;;  %v1018_v4 = vunpack.i.l.bf16 %v1363_v11  ;;  %v539_v58 = vpack.c.b16 %v535_v40, %v531_v20 }
  0x99   :  { %v977_v5 = vpop.permute.xlu0 %976  ;;  %v1409_v42 = vpop.permute.xlu2 %1031  ;;  %v294_v7 = vsel %vm180_vm12, %v278_v6, 0.0  ;;  %v1414_v41 = vpack.c.bf16 %v290_v18, %v289_v31  ;;  %v550_v26 = vunpack.c.l.b16 %v295_v21  ;;  %v551_v36 = vunpack.c.h.b16 %v295_v21 }
  0x9a   :  { %v979_v44 = vunpack.i.h.bf16 %v977_v5  ;;  %v978_v13 = vunpack.i.l.bf16 %v977_v5  ;;  %v982_v19 = vpop.permute.xlu1 %981  ;;  %v554_v24 = vunpack.c.l.b16 %v297_v0  ;;  %v555_v63 = vunpack.c.h.b16 %v297_v0 }
  0x9b   :  { %v984_v32 = vunpack.i.h.bf16 %v982_v19  ;;  %v983_v10 = vunpack.i.l.bf16 %v982_v19  ;;  %v1480_v5 = vpack.c.bf16 %v294_v7, %v293_v3  ;;  %v1033_v7 = vunpack.i.l.bf16 %v1409_v42 }
  0x9c   :  { %v370_v29 = vsel %vm368_vm4, %v924_v53, %v979_v44  ;;  %v369_v20 = vsel %vm368_vm4, %v923_v54, %v978_v13  ;;  %v375_v6 = vsel %vm368_vm4, %v978_v13, %v928_v47  ;;  %v376_v40 = vsel %vm368_vm4, %v979_v44, %v929_v46 }
  0x9d   :  { %v317_v48 = vsel %vm315_vm0, %v944_v33, %v984_v32  ;;  %v316_v35 = vsel %vm315_vm0, %v943_v34, %v983_v10  ;;  %v322_v46 = vsel %vm315_vm0, %v983_v10, %v933_v57  ;;  %v323_v47 = vsel %vm315_vm0, %v984_v32, %v934_v56  ;;  %v903_v34 = vld [vmem:[%s1912_s1 + $0x4] sm:$0xf]  ;;  %v887_v57 = vld [vmem:[%s1912_s1 + $0x8] sm:$0xf0] }
  0x9e   :  { %v558_v54 = vpack.c.b16 %v554_v24, %v550_v26  ;;  %v559_v31 = vpack.c.b16 %v555_v63, %v551_v36  ;;  %v388_v33 = vsel %vm1367_vm13, %v375_v6, 0.0  ;;  %v392_v22 = vsel %vm1367_vm13, %v376_v40, 0.0 }
  0x9f   :  { %v1466_v55 = vpack.c.bf16 %v388_v33, %v369_v20  ;;  %v1468_v60 = vpack.c.bf16 %v392_v22, %v370_v29  ;;  %v342_v56 = vsel %vm81_vm15, %v316_v35, 0.0  ;;  %v343_v43 = vsel %vm1436_vm3, %v322_v46, 0.0 }
  0xa0   :  { %655 = vmatpush.bf16.msra.mxu0 %v558_v54  ;;  %683 = vmatpush.bf16.msra.mxu2 %v559_v31  ;;  %v346_v21 = vsel %vm81_vm15, %v317_v48, 0.0  ;;  %v347_v18 = vsel %vm1436_vm3, %v323_v47, 0.0  ;;  %v1478_v0 = vpack.c.bf16 %v343_v43, %v342_v56  ;;  %vm1484_vm0 = vcmp.ge.s32.totalorder %v26_v30, 16 }
  0xa1   :  { %v1034_v13 = vunpack.i.h.bf16 %v1409_v42  ;;  %v1489_v19 = vpop.permute.xlu0 %991  ;;  %v1491_v26 = vpop.permute.xlu2 %1046  ;;  %v592_v36 = vunpack.c.l.b16 %v1466_v55  ;;  %v596_v32 = vunpack.c.l.b16 %v1468_v60  ;;  %vm168_vm4 = vcmp.lt.s32.totalorder %v1191_v23, 15  ;;  %vm1568_vm3 = vmand %vm1484_vm0, %vm177_vm8 }
  0xa2   :  { %v1496_v3 = vor.u32 %v903_v34, %v887_v57  ;;  %v994_v30 = vunpack.i.h.bf16 %v1489_v19  ;;  %v993_v10 = vunpack.i.l.bf16 %v1489_v19  ;;  %v1501_v24 = vpop.permute.xlu1 %996  ;;  %v552_v63 = vunpack.c.l.b16 %v1414_v41 }
  0xa3   :  { %v999_v29 = vunpack.i.h.bf16 %v1501_v24  ;;  %v998_v20 = vunpack.i.l.bf16 %v1501_v24  ;;  %v600_v6 = vpack.c.b16 %v596_v32, %v592_v36  ;;  %v1506_v40 = vpack.c.bf16 %v347_v18, %v346_v21 }
  0xa4   :  { %v227_v53 = vsel %vm221_vm1, %v989_v45, %v994_v30  ;;  %v226_v48 = vsel %vm221_vm1, %v988_v62, %v993_v10  ;;  %v593_v35 = vunpack.c.h.b16 %v1466_v55  ;;  %656 = vmatpush.bf16.msra.mxu0 %v1404_v1  ;;  %684 = vmatpush.bf16.msra.mxu2 %v539_v58  ;;  %v572_v46 = vunpack.c.l.b16 %v1478_v0 }
  0xa5   :  { %v229_v47 = vsel %vm221_vm1, %v999_v29, %v989_v45  ;;  %v228_v54 = vsel %vm221_vm1, %v998_v20, %v988_v62  ;;  %709 = vmatpush.bf16.msrb.mxu1 %v600_v6  ;;  %v576_v1 = vunpack.c.l.b16 %v1506_v40  ;;  %v239_v58 = vsel %vm80_vm2, %v226_v48, 0.0 }
  0xa6   :  { %v597_v31 = vunpack.c.h.b16 %v1468_v60  ;;  %v238_v33 = vsel %vm79_vm5, %v228_v54, 0.0  ;;  %v242_v45 = vsel %vm79_vm5, %v229_v47, 0.0  ;;  %v243_v49 = vsel %vm80_vm2, %v227_v53, 0.0 }
  0xa7   :  { %v580_v22 = vpack.c.b16 %v576_v1, %v572_v46  ;;  %v246_v34 = vpack.c.bf16 %v239_v58, %v238_v33  ;;  %v248_v62 = vpack.c.bf16 %v243_v49, %v242_v45  ;;  %vm649_vm9 = vcmask 130048  }
  0xa8   :  { %v1049_v57 = vunpack.i.h.bf16 %v1491_v26  ;;  %v556_v56 = vunpack.c.l.b16 %v1480_v5  ;;  %892 = vmatmul.msk.bf16.vlgmr.msra.gmra.mxu3 %vm649_vm9, %v1496_v3  ;;  %v1553_v43 = vpack.c.bf16 %v45_v17, %v44_v12  ;;  %v1932_v21 = vmax.f32 %v1157_v9, 0.0  ;;  %891 = vmatmul.msk.bf16.vlgmr.msra.gmra.mxu1 %vm649_vm9, %v1496_v3 }
  0xa9   :  { %v1933_v18 = vmax.f32 %v1181_v16, 0.0  ;;  %710 = vmatpush.bf16.msrb.mxu1 %v580_v22  ;;  %v1007_v32 = vpop.permute.xlu0 %1006  ;;  %v1062_v6 = vpop.permute.xlu2 %1061  ;;  %v510_v53 = vunpack.c.l.b16 %v246_v34  ;;  %v514_v48 = vunpack.c.l.b16 %v248_v62  ;;  %v511_v46 = vunpack.c.h.b16 %v246_v34 }
  0xaa   :  { %v515_v8 = vunpack.c.h.b16 %v248_v62  ;;  %v1009_v47 = vunpack.i.h.bf16 %v1007_v32  ;;  %v1008_v15 = vunpack.i.l.bf16 %v1007_v32  ;;  %v1012_v12 = vpop.permute.xlu1 %1011  ;;  %v1064_v17 = vunpack.i.h.bf16 %v1062_v6 }
  0xab   :  { %v1559_v36 = vpack.c.bf16 %v1933_v18, %v1932_v21  ;;  %v1063_v54 = vunpack.i.l.bf16 %v1062_v6  ;;  %v1014_v9 = vunpack.i.h.bf16 %v1012_v12  ;;  %v1013_v16 = vunpack.i.l.bf16 %v1012_v12 }
  0xac   :  { %v518_v1 = vpack.c.b16 %v514_v48, %v510_v53  ;;  %v519_v58 = vpack.c.b16 %v515_v8, %v511_v46  ;;  %v1048_v45 = vunpack.i.l.bf16 %v1491_v26  ;;  %v176_v49 = vsel %vm168_vm4, %v1019_v2, %v1009_v47 }
  0xad   :  { %v175_v22 = vsel %vm168_vm4, %v1018_v4, %v1008_v15  ;;  %v560_v34 = vpack.c.b16 %v556_v56, %v552_v63  ;;  %v174_v62 = vsel %vm168_vm4, %v1009_v47, %v1014_v9  ;;  %v173_v21 = vsel %vm168_vm4, %v1008_v15, %v1013_v16 }
  0xae   :  { %v169_v18 = vsel %vm168_vm4, %v1063_v54, %v1018_v4  ;;  %v170_v32 = vsel %vm168_vm4, %v1064_v17, %v1019_v2  ;;  %657 = vmatpush.bf16.msra.mxu0 %v518_v1  ;;  %685 = vmatpush.bf16.msra.mxu2 %v519_v58  ;;  %v193_v63 = vsel %vm1568_vm3, %v175_v22, 0.0  ;;  %v194_v56 = vsel %vm178_vm6, %v173_v21, 0.0 }
  0xaf   :  { %711 = vmatpush.bf16.msrb.mxu1 %v560_v34  ;;  %v197_v6 = vsel %vm1568_vm3, %v176_v49, 0.0  ;;  %v198_v4 = vsel %vm178_vm6, %v174_v62, 0.0  ;;  %v201_v53 = vpack.c.bf16 %v194_v56, %v193_v63  ;;  %v532_v48 = vunpack.c.l.b16 %v1553_v43  ;;  %vm1613_vm6 = vmand %vm1367_vm13, %vm180_vm12 }
  0xb0   :  { %v203_v11 = vpack.c.bf16 %v198_v4, %v197_v6  ;;  %v536_v2 = vunpack.c.l.b16 %v1559_v36  ;;  %v171_v46 = vsel %vm168_vm4, %v1013_v16, %v1063_v54  ;;  %v172_v8 = vsel %vm168_vm4, %v1014_v9, %v1064_v17 }
  0xb1   :  { %v573_v47 = vunpack.c.h.b16 %v1478_v0  ;;  %v577_v15 = vunpack.c.h.b16 %v1506_v40  ;;  %v1022_v12 = vpop.permute.xlu0 %1021  ;;  %v490_v1 = vunpack.c.l.b16 %v201_v53  ;;  %v491_v33 = vunpack.c.h.b16 %v201_v53 }
  0xb2   :  { %v494_v58 = vunpack.c.l.b16 %v203_v11  ;;  %v495_v49 = vunpack.c.h.b16 %v203_v11  ;;  %v1024_v22 = vunpack.i.h.bf16 %v1022_v12  ;;  %v1023_v34 = vunpack.i.l.bf16 %v1022_v12  ;;  %v1027_v62 = vpop.permute.xlu1 %1026 }
  0xb3   :  { %v540_v17 = vpack.c.b16 %v536_v2, %v532_v48  ;;  %v553_v0 = vunpack.c.h.b16 %v1414_v41  ;;  %v1029_v40 = vunpack.i.h.bf16 %v1027_v62  ;;  %v1028_v9 = vunpack.i.l.bf16 %v1027_v62 }
  0xb4   :  { %v498_v16 = vpack.c.b16 %v494_v58, %v490_v1  ;;  %v499_v21 = vpack.c.b16 %v495_v49, %v491_v33  ;;  %v415_v63 = vsel %vm413_vm7, %v959_v52, %v1024_v22  ;;  %v414_v14 = vsel %vm413_vm7, %v958_v28, %v1023_v34 }
  0xb5   :  { %v420_v56 = vsel %vm413_vm7, %v1023_v34, %v948_v51  ;;  %v421_v41 = vsel %vm413_vm7, %v1024_v22, %v949_v50  ;;  %712 = vmatpush.bf16.msrb.mxu1 %v540_v17  ;;  %v131_v52 = vsel %vm123_vm11, %v1034_v13, %v1029_v40  ;;  %v130_v25 = vsel %vm123_vm11, %v1033_v7, %v1028_v9 }
  0xb6   :  { %658 = vmatpush.bf16.msra.mxu0 %v498_v16  ;;  %686 = vmatpush.bf16.msra.mxu2 %v499_v21  ;;  %v436_v28 = vsel %vm179_vm10, %v414_v14, 0.0  ;;  %v437_v61 = vsel %vm1613_vm6, %v420_v56, 0.0  ;;  %v440_v50 = vsel %vm179_vm10, %v415_v63, 0.0  ;;  %v441_v51 = vsel %vm1613_vm6, %v421_v41, 0.0 }
  0xb7   :  { %v1650_v6 = vpack.c.bf16 %v437_v61, %v436_v28  ;;  %v557_v4 = vunpack.c.h.b16 %v1480_v5  ;;  %v1653_v53 = vpack.c.bf16 %v441_v51, %v440_v50  ;;  %v601_v11 = vpack.c.b16 %v597_v31, %v593_v35 }
  0xb8   :  { %v581_v48 = vpack.c.b16 %v577_v15, %v573_v47  ;;  %v1938_v2 = vand.u32 255, %v1212_v37  ;;  %v140_v58 = vsel %vm1484_vm0, %v130_v25, 0.0  ;;  %v144_v5 = vsel %vm1484_vm0, %v131_v52, 0.0 }
  0xb9   :  { %v612_v1 = vunpack.c.l.b16 %v1650_v6  ;;  %v196_v37 = vsel %vm180_vm12, %v169_v18, 0.0  ;;  %v1680_v60 = vpop.permute.xlu0 %1036  ;;  %v616_v35 = vunpack.c.l.b16 %v1653_v53  ;;  %vm66_vm13 = vcmp.lt.s32.totalorder %v1191_v23, 17 }
  0xba   :  { %vm1661_vm7 = vcmp.ge.s32.totalorder %v1938_v2, 16  ;;  %v200_v15 = vsel %vm180_vm12, %v170_v32, 0.0  ;;  %v1039_v33 = vunpack.i.h.bf16 %v1680_v60  ;;  %v1038_v49 = vunpack.i.l.bf16 %v1680_v60  ;;  %v1042_v18 = vpop.permute.xlu1 %1041 }
  0xbb   :  { %vm1674_vm8 = vmand %vm1661_vm7, %vm179_vm10  ;;  %v561_v22 = vpack.c.b16 %v557_v4, %v553_v0  ;;  %v533_v34 = vunpack.c.h.b16 %v1553_v43  ;;  %v1044_v62 = vunpack.i.h.bf16 %v1042_v18  ;;  %v1043_v54 = vunpack.i.l.bf16 %v1042_v18 }
  0xbc   :  { %v195_v31 = vsel %vm1674_vm8, %v171_v46, 0.0  ;;  %v199_v47 = vsel %vm1674_vm8, %v172_v8, 0.0  ;;  %v620_v17 = vpack.c.b16 %v616_v35, %v612_v1  ;;  %v128_v46 = vsel %vm123_vm11, %v1028_v9, %v1038_v49  ;;  %vm1746_vm10 = vmand %vm1484_vm0, %vm79_vm5 }
  0xbd   :  { %v1693_v16 = vpack.c.bf16 %v196_v37, %v195_v31  ;;  %v129_v32 = vsel %vm123_vm11, %v1029_v40, %v1039_v33  ;;  %v1703_v8 = vpack.c.bf16 %v200_v15, %v199_v47  ;;  %v537_v0 = vunpack.c.h.b16 %v1559_v36 }
  0xbe   :  { %v225_v43 = vsel %vm221_vm1, %v994_v30, %v1044_v62  ;;  %v222_v21 = vsel %vm221_vm1, %v1043_v54, %v998_v20  ;;  %v223_v9 = vsel %vm221_vm1, %v1044_v62, %v999_v29  ;;  %v224_v36 = vsel %vm221_vm1, %v993_v10, %v1043_v54  ;;  %730 = vmatpush.bf16.msrb.mxu3 %v620_v17  ;;  %v885_v54 = vld [vmem:[%s1912_s1] sm:$0xf] }
  0xbf   :  { %v148_v40 = vpack.c.bf16 %v128_v46, %v140_v58  ;;  %v150_v63 = vpack.c.bf16 %v129_v32, %v144_v5  ;;  %v240_v30 = vsel %vm81_vm15, %v224_v36, 0.0  ;;  %v241_v20 = vsel %vm82_vm14, %v222_v21, 0.0  ;;  %v629_v21 = vld [vmem:[%s1913_s2 + $0x8] sm:$0xff] }
  0xc0   :  { %v244_v24 = vsel %vm81_vm15, %v225_v43, 0.0  ;;  %v245_v29 = vsel %vm82_vm14, %v223_v9, 0.0  ;;  %v247_v19 = vpack.c.bf16 %v241_v20, %v240_v30  ;;  %v492_v14 = vunpack.c.l.b16 %v1693_v16 }
  0xc1   :  { %v470_v10 = vunpack.c.l.b16 %v148_v40  ;;  %v474_v56 = vunpack.c.l.b16 %v150_v63  ;;  %v471_v41 = vunpack.c.h.b16 %v148_v40  ;;  %v475_v52 = vunpack.c.h.b16 %v150_v63  ;;  %893 = vmatmul.msk.bf16.vlgmr.msrb.gmra.mxu3 %vm649_vm9, %v1496_v3  ;;  %v1733_v25 = vpop.permute.xlu0 %1051 }
  0xc2   :  { %737 = vmatpush.bf16.msra.mxu3 %v601_v11  ;;  %v249_v28 = vpack.c.bf16 %v245_v29, %v244_v24  ;;  %v512_v61 = vunpack.c.l.b16 %v247_v19  ;;  %v496_v50 = vunpack.c.l.b16 %v1703_v8  ;;  %v513_v51 = vunpack.c.h.b16 %v247_v19  ;;  %v1738_v2 = vpop.permute.xlu1 %1056 }
  0xc3   :  { %v1054_v4 = vunpack.i.h.bf16 %v1733_v25  ;;  %v1053_v11 = vunpack.i.l.bf16 %v1733_v25  ;;  %v478_v1 = vpack.c.b16 %v474_v56, %v470_v10  ;;  %v479_v58 = vpack.c.b16 %v475_v52, %v471_v41 }
  0xc4   :  { %v1059_v5 = vunpack.i.h.bf16 %v1738_v2  ;;  %v1058_v55 = vunpack.i.l.bf16 %v1738_v2  ;;  %v516_v37 = vunpack.c.l.b16 %v249_v28  ;;  %v613_v31 = vunpack.c.h.b16 %v1650_v6 }
  0xc5   :  { %v71_v38 = vsel %vm66_vm13, %v1048_v45, %v1053_v11  ;;  %659 = vmatpush.bf16.msra.mxu0 %v478_v1  ;;  %687 = vmatpush.bf16.msra.mxu2 %v479_v58  ;;  %v517_v44 = vunpack.c.h.b16 %v249_v28  ;;  %v617_v47 = vunpack.c.h.b16 %v1653_v53  ;;  %v904_v53 = vld [vmem:[%s1912_s1 + $0x4] sm:$0xf0]  ;;  %v541_v17 = vpack.c.b16 %v537_v0, %v533_v34  ;;  %v628_v0 = vld [vmem:[%s1913_s2] sm:$0xff] }
  0xc6   :  { %738 = vmatpush.bf16.msra.mxu3 %v581_v48  ;;  %v72_v48 = vsel %vm66_vm13, %v1049_v57, %v1054_v4  ;;  %v74_v6 = vsel %vm66_vm13, %v1059_v5, %v1049_v57  ;;  %v73_v15 = vsel %vm66_vm13, %v1058_v55, %v1048_v45  ;;  %v520_v18 = vpack.c.b16 %v516_v37, %v512_v61 }
  0xc7   :  { %v96_v62 = vsel %vm80_vm2, %v71_v38, 0.0  ;;  %v95_v26 = vsel %vm1746_vm10, %v73_v15, 0.0  ;;  %v99_v57 = vsel %vm1746_vm10, %v74_v6, 0.0  ;;  %v100_v45 = vsel %vm80_vm2, %v72_v48, 0.0  ;;  %vm1800_vm2 = vmand %vm1661_vm7, %vm81_vm15 }
  0xc8   :  { %713 = vmatpush.bf16.msrb.mxu1 %v520_v18  ;;  %v500_v46 = vpack.c.b16 %v496_v50, %v492_v14  ;;  %v103_v32 = vpack.c.bf16 %v96_v62, %v95_v26  ;;  %v105_v43 = vpack.c.bf16 %v100_v45, %v99_v57  ;;  %v521_v9 = vpack.c.b16 %v517_v44, %v513_v51 }
  0xc9   :  { %v1789_v34 = vor.u32 %v904_v53, %v885_v54  ;;  %v1067_v36 = vpop.permute.xlu0 %1066  ;;  %v1094_v20 = vmov 0   ;;  %v493_v14 = vunpack.c.h.b16 %v1693_v16  ;;  %v497_v10 = vunpack.c.h.b16 %v1703_v8 }
  0xca   :  { %739 = vmatpush.bf16.msra.mxu3 %v561_v22  ;;  %v621_v22 = vpack.c.b16 %v617_v47, %v613_v31  ;;  %v450_v40 = vunpack.c.l.b16 %v103_v32  ;;  %v454_v27 = vunpack.c.l.b16 %v105_v43  ;;  %v451_v63 = vunpack.c.h.b16 %v103_v32  ;;  %1076 = vset.pattern.permute.xlu0 %v1094_v20  ;;  %v1072_v19 = vpop.permute.xlu1 %1071 }
  0xcb   :  { %v455_v30 = vunpack.c.h.b16 %v105_v43  ;;  %1075 = vset.pattern.permute.xlu2 %v1094_v20  ;;  %v1069_v24 = vunpack.i.h.bf16 %v1067_v36  ;;  %v1068_v29 = vunpack.i.l.bf16 %v1067_v36  ;;  %637 = vperm.xlu0 %1076, %v629_v21   ;;  %v1074_v56 = vunpack.i.h.bf16 %v1072_v19  ;;  %v851_v21 = vld [vmem:[%s1914_s4] sm:$0xff] }
  0xcc   :  { %714 = vmatpush.bf16.msrb.mxu1 %v500_v46  ;;  %v1073_v41 = vunpack.i.l.bf16 %v1072_v19  ;;  %v458_v52 = vpack.c.b16 %v454_v27, %v450_v40  ;;  %632 = vperm.xlu2 %1075, %v628_v0   ;;  %v501_v1 = vpack.c.b16 %v497_v10, %v493_v14  ;;  %v905_v19 = vld [vmem:[%s1915_s3] sm:$0xff] }
  0xcd   :  { %v459_v28 = vpack.c.b16 %v455_v30, %v451_v63  ;;  %v125_v16 = vsel %vm123_vm11, %v1069_v24, %v1034_v13  ;;  %v124_v8 = vsel %vm123_vm11, %v1068_v29, %v1033_v7  ;;  %v126_v59 = vsel %vm123_vm11, %v1038_v49, %v1068_v29  ;;  %1077 = vset.pattern.permute.xlu1 %v1094_v20 }
  0xce   :  { %740 = vmatpush.bf16.msra.mxu3 %v541_v17  ;;  %v127_v50 = vsel %vm123_vm11, %v1039_v33, %v1069_v24  ;;  %v70_v13 = vsel %vm66_vm13, %v1054_v4, %v1074_v56  ;;  %v67_v42 = vsel %vm66_vm13, %v1073_v41, %v1058_v55  ;;  %v68_v7 = vsel %vm66_vm13, %v1074_v56, %v1059_v5  ;;  %v852_v5 = vld [vmem:[%s1914_s4 + $0x8] sm:$0xff] }
  0xcf   :  { %v69_v60 = vsel %vm66_vm13, %v1053_v11, %v1073_v41  ;;  %660 = vmatpush.bf16.msra.mxu0 %v458_v52  ;;  %688 = vmatpush.bf16.msra.mxu2 %v459_v28  ;;  %v142_v33 = vsel %vm1661_vm7, %v126_v59, 0.0  ;;  %v146_v49 = vsel %vm1661_vm7, %v127_v50, 0.0  ;;  %v98_v4 = vsel %vm82_vm14, %v67_v42, 0.0 }
  0xd0   :  { %v97_v51 = vsel %vm1800_vm2, %v69_v60, 0.0  ;;  %v149_v25 = vpack.c.bf16 %v124_v8, %v142_v33  ;;  %v151_v2 = vpack.c.bf16 %v125_v16, %v146_v49  ;;  %v101_v23 = vsel %vm1800_vm2, %v70_v13, 0.0  ;;  %855 = vperm.xlu1 %1077, %v851_v21  }
  0xd1   :  { %v102_v11 = vsel %vm82_vm14, %v68_v7, 0.0  ;;  %v104_v12 = vpack.c.bf16 %v98_v4, %v97_v51 }
  0xd2   :  { %741 = vmatpush.bf16.msra.mxu3 %v521_v9  ;;  %661 = vmatmul.bf16.vlgmr.msra.gmra.mxu0 %v1789_v34  ;;  %v106_v58 = vpack.c.bf16 %v102_v11, %v101_v23  ;;  %v472_v55 = vunpack.c.l.b16 %v149_v25  ;;  %v476_v37 = vunpack.c.l.b16 %v151_v2  ;;  %v473_v35 = vunpack.c.h.b16 %v149_v25 }
  0xd3   :  { %758 = vmatpush.bf16.msrb.mxu0 %v621_v22  ;;  %689 = vmatmul.bf16.vlgmr.msra.gmra.mxu2 %v1789_v34  ;;  %v477_v31 = vunpack.c.h.b16 %v151_v2  ;;  %v452_v39 = vunpack.c.l.b16 %v104_v12  ;;  %v453_v47 = vunpack.c.h.b16 %v104_v12 }
  0xd4   :  { %v480_v48 = vpack.c.b16 %v476_v37, %v472_v55  ;;  %v456_v44 = vunpack.c.l.b16 %v106_v58  ;;  %860 = vperm.xlu2 %1075, %v852_v5   ;;  %v457_v6 = vunpack.c.h.b16 %v106_v58  ;;  %v1078_v58 = vld [vmem:[%s1911_s0] sm:$0xff]  ;;  %v1079_v37 = vld [vmem:[%s1911_s0 + $0x8] sm:$0xff] }
  0xd5   :  { %v481_v38 = vpack.c.b16 %v477_v31, %v473_v35 }
  0xd6   :  { %742 = vmatpush.bf16.msra.mxu3 %v501_v1  ;;  %715 = vmatpush.bf16.msrb.mxu1 %v480_v48  ;;  %v460_v15 = vpack.c.b16 %v456_v44, %v452_v39  ;;  %v461_v18 = vpack.c.b16 %v457_v6, %v453_v47 }
  0xda   :  { %743 = vmatpush.bf16.msra.mxu3 %v481_v38  ;;  %716 = vmatpush.bf16.msrb.mxu1 %v460_v15 }
  0xdd   :  { %717 = vmatmul.bf16.vlgmr.msrb.gmra.mxu1 %v1789_v34 }
  0xde   :  { %744 = vmatpush.bf16.msra.mxu3 %v461_v18 }
  0xe1   :  { %745 = vmatmul.bf16.vlgmr.msra.gmra.mxu3 %v1789_v34 }
  0xe2   :  { %894 = vmatmul.msk.bf16.vlgmr.msrb.gmra.mxu0 %vm649_vm9, %v1496_v3 }
 0x125   :  { %v676_v53 = vpop.f32.mrf.mxu1 }
 0x126   :  { %v633_v57 = vpop.permute.xlu2 %632 }
 0x12b   :  { %v704_v62 = vpop.f32.mrf.mxu3 }
 0x12d   :  { %v678_v45 = vpop.f32.mrf.mxu1 }
 0x133   :  { %v706_v54 = vpop.f32.mrf.mxu3 }
 0x13d   :  { %v638_v32 = vpop.permute.xlu0 %637 }
 0x142   :  { %v856_v12 = vpop.permute.xlu1 %855 }
 0x144   :  { %v732_v26 = vpop.f32.mrf.mxu3 }
 0x14c   :  { %v734_v0 = vpop.f32.mrf.mxu3 }
 0x14f   :  { %v662_v17 = vpop.f32.mrf.mxu0 }
 0x150   :  { %v663_v46 = vadd.f32 %v662_v17, %v633_v57 }
 0x152   :  { %v677_v34 = vadd.f32 %v676_v53, %v663_v46 }
 0x154   :  { %v765_v63 = vmax.f32 %v677_v34, 0.0 }
 0x156   :  { %v690_v43 = vpop.f32.mrf.mxu2 }
 0x157   :  { %v664_v9 = vpop.f32.mrf.mxu0  ;;  %v691_v36 = vadd.f32 %v690_v43, %v633_v57 }
 0x158   :  { %v665_v22 = vadd.f32 %v664_v9, %v638_v32 }
 0x159   :  { %v705_v24 = vadd.f32 %v704_v62, %v691_v36 }
 0x15a   :  { %v679_v3 = vadd.f32 %v678_v45, %v665_v22  ;;  %v718_v40 = vpop.f32.mrf.mxu1 }
 0x15b   :  { %v719_v14 = vadd.f32 %v718_v40, %v633_v57  ;;  %v766_v52 = vmax.f32 %v705_v24, 0.0 }
 0x15c   :  { %v769_v27 = vmax.f32 %v679_v3, 0.0 }
 0x15d   :  { %v733_v16 = vadd.f32 %v732_v26, %v719_v14 }
 0x15e   :  { %v692_v30 = vpop.f32.mrf.mxu2  ;;  %v775_v20 = vpack.c.bf16 %v769_v27, %v765_v63 }
 0x15f   :  { %v693_v29 = vadd.f32 %v692_v30, %v638_v32  ;;  %v760_v56 = vpop.f32.mrf.mxu0  ;;  %v767_v42 = vmax.f32 %v733_v16, 0.0 }
 0x160   :  { %794 = vmatpush.bf16.msrb.mxu2 %v775_v20 }
 0x161   :  { %v707_v10 = vadd.f32 %v706_v54, %v693_v29  ;;  %v861_v54 = vpop.permute.xlu2 %860 }
 0x162   :  { %v720_v61 = vpop.f32.mrf.mxu1 }
 0x163   :  { %v770_v28 = vmax.f32 %v707_v10, 0.0  ;;  %899 = vmatmul.msk.bf16.vlgmr.msrb.gmra.mxu2 %vm649_vm9, %v905_v19  ;;  %v721_v8 = vadd.f32 %v720_v61, %v638_v32 }
 0x164   :  { %v746_v41 = vpop.f32.mrf.mxu3 }
 0x165   :  { %v776_v59 = vpack.c.bf16 %v770_v28, %v766_v52  ;;  %v735_v50 = vadd.f32 %v734_v0, %v721_v8  ;;  %v747_v13 = vadd.f32 %v746_v41, %v633_v57 }
 0x167   :  { %808 = vmatpush.bf16.msra.mxu1 %v776_v59  ;;  %v771_v7 = vmax.f32 %v735_v50, 0.0  ;;  %v761_v49 = vadd.f32 %v760_v56, %v747_v13  ;;  %v762_v4 = vpop.f32.mrf.mxu0 }
 0x169   :  { %v777_v60 = vpack.c.bf16 %v771_v7, %v767_v42  ;;  %v768_v2 = vmax.f32 %v761_v49, 0.0 }
 0x16a   :  { %900 = vmatmul.msk.bf16.vlgmr.msra.gmra.mxu1 %vm649_vm9, %v905_v19 }
 0x16b   :  { %822 = vmatpush.bf16.msra.mxu0 %v777_v60 }
 0x16c   :  { %v748_v33 = vpop.f32.mrf.mxu3 }
 0x16d   :  { %v749_v51 = vadd.f32 %v748_v33, %v638_v32 }
 0x16e   :  { %901 = vmatmul.msk.bf16.vlgmr.msra.gmra.mxu0 %vm649_vm9, %v905_v19 }
 0x16f   :  { %v763_v25 = vadd.f32 %v762_v4, %v749_v51 }
 0x171   :  { %v772_v23 = vmax.f32 %v763_v25, 0.0 }
 0x173   :  { %v778_v11 = vpack.c.bf16 %v772_v23, %v768_v2 }
 0x175   :  { %836 = vmatpush.bf16.msra.mxu2 %v778_v11 }
 0x178   :  { %902 = vmatmul.msk.bf16.vlgmr.msra.gmra.mxu2 %vm649_vm9, %v905_v19 }
 0x1e6   :  { %v796_v1 = vpop.f32.mrf.mxu2 }
 0x1e7   :  { %v843_v5 = vadd.f32 %v1078_v58, %v796_v1  ;;  %v810_v55 = vpop.f32.mrf.mxu1 }
 0x1e8   :  { %v844_v35 = vadd.f32 %v1079_v37, %v810_v55 }
 0x1e9   :  { %v863_v31 = vadd.f32 %v856_v12, %v843_v5 }
 0x1ea   :  { %v864_v48 = vadd.f32 %v856_v12, %v844_v35 }
 0x1eb   :  { %871 = vst [vmem:[%s1916_s5] sm:$0xff] %v863_v31  ;;  %v824_v38 = vpop.f32.mrf.mxu0 }
 0x1ec   :  { %872 = vst [vmem:[%s1916_s5 + $0x8] sm:$0xff] %v864_v48 }
 0x1ee   :  { %v798_v47 = vpop.f32.mrf.mxu2 }
 0x1ef   :  { %v812_v18 = vpop.f32.mrf.mxu1 }
 0x1f3   :  { %v1080_v39 = vld [vmem:[%s1911_s0 + $0x10] sm:$0xff]  ;;  %v1081_v6 = vld [vmem:[%s1911_s0 + $0x20] sm:$0xff]  ;;  %v1082_v53 = vld [vmem:[%s1911_s0 + $0x28] sm:$0xff]  ;;  %v826_v45 = vpop.f32.mrf.mxu0 }
 0x1f4   :  { %v845_v44 = vadd.f32 %v1080_v39, %v824_v38  ;;  %v847_v15 = vadd.f32 %v1081_v6, %v798_v47  ;;  %v848_v17 = vadd.f32 %v1082_v53, %v812_v18 }
 0x1f6   :  { %v865_v62 = vadd.f32 %v856_v12, %v845_v44  ;;  %v867_v26 = vadd.f32 %v861_v54, %v847_v15  ;;  %v868_v57 = vadd.f32 %v861_v54, %v848_v17 }
 0x1f8   :  { %873 = vst [vmem:[%s1916_s5 + $0x10] sm:$0xff] %v865_v62 }
 0x1f9   :  { %875 = vst [vmem:[%s1916_s5 + $0x20] sm:$0xff] %v867_v26 }
 0x1fa   :  { %876 = vst [vmem:[%s1916_s5 + $0x28] sm:$0xff] %v868_v57 }
 0x1fb   :  { %v838_v21 = vpop.f32.mrf.mxu2 }
 0x201   :  { %v1083_v46 = vld [vmem:[%s1911_s0 + $0x30] sm:$0xff] }
 0x202   :  { %v849_v32 = vadd.f32 %v1083_v46, %v826_v45 }
 0x203   :  { %v840_v0 = vpop.f32.mrf.mxu2 }
 0x204   :  { %v869_v43 = vadd.f32 %v861_v54, %v849_v32 }
 0x206   :  { %877 = vst [vmem:[%s1916_s5 + $0x30] sm:$0xff] %v869_v43 }
 0x20d   :  { %v1084_v9 = vld [vmem:[%s1911_s0 + $0x18] sm:$0xff] }
 0x20e   :  { %v846_v22 = vadd.f32 %v1084_v9, %v838_v21 }
 0x210   :  { %v866_v34 = vadd.f32 %v856_v12, %v846_v22 }
 0x212   :  { %874 = vst [vmem:[%s1916_s5 + $0x18] sm:$0xff] %v866_v34 }
 0x219   :  { %v1085_v3 = vld [vmem:[%s1911_s0 + $0x38] sm:$0xff] }
 0x21a   :  { %v850_v36 = vadd.f32 %v1085_v3, %v840_v0 }
 0x21c   :  { %v870_v40 = vadd.f32 %v861_v54, %v850_v36 }
 0x21e   :  { %878 = vst [vmem:[%s1916_s5 + $0x38] sm:$0xff] %v870_v40 }

</bundles_post_ra>
